<compile_context>
chip_gen: v7x
topology: tpu7x:2x2x1
jax: 0.10.0
libtpu: 0.0.40
codegen_flags: <defaults>
</compile_context>

<pallas_src>
import functools
import math

import jax
import jax.numpy as jnp
from jax.experimental import pallas as pl
from jax.experimental.pallas import tpu as pltpu

_LANES = 128  # vreg lane width


def _round_up(x, m):
    return (x + m - 1) // m * m


def _ls_kl_partials_kernel(x_ref, tgt_ref, sum_ref, pick_ref, *,
                           tile_v, padding_idx):
    """Accumulate per-row (a) sum of log-probs excluding the padding column and
    (b) log-prob at the target column, folded into lane-dense (tile_b, 128)
    partials that stay resident across the vocab ("arbitrary") grid axis."""
    j = pl.program_id(1)  # vocab tile index (reduction axis, innermost)

    @pl.when(j == 0)
    def _():
        sum_ref[...] = jnp.zeros_like(sum_ref)
        pick_ref[...] = jnp.zeros_like(pick_ref)

    tile_b = x_ref.shape[0]
    tgt = tgt_ref[...]                                        # (tile_b, 1) int32
    lane = jax.lax.broadcasted_iota(jnp.int32, (1, _LANES), 1)
    tgt_local = tgt - j * tile_v                              # target col rel. to tile

    # Static location of the padding column inside (tile, chunk, lane).
    pad_tile = padding_idx // tile_v
    pad_chunk = (padding_idx % tile_v) // _LANES
    pad_lane = padding_idx % _LANES

    sum_acc = jnp.zeros((tile_b, _LANES), jnp.float32)
    pick_acc = jnp.zeros((tile_b, _LANES), jnp.float32)

    # Static 128-lane chunk loop; each chunk is sliced from the ref directly so
    # live data stays at (tile_b, 128).
    for k in range(tile_v // _LANES):
        chunk = x_ref[:, k * _LANES:(k + 1) * _LANES].astype(jnp.float32)
        is_tgt = lane == (tgt_local - k * _LANES)             # (tile_b, 128)
        pick_acc = pick_acc + jnp.where(is_tgt, chunk, 0.0)
        if k == pad_chunk:
            # Drop the padding column from the plain row-sum (only the single
            # chunk/tile that actually contains it pays these two extra ops).
            pad_mask = (lane == pad_lane) & (j == pad_tile)
            chunk = jnp.where(pad_mask, 0.0, chunk)
        sum_acc = sum_acc + chunk

    sum_ref[...] += sum_acc
    pick_ref[...] += pick_acc


def label_smoothing_loss(output, target, *, label_smoothing, tgt_vocab_size,
                         ignore_index, tile_b=None, tile_v=None):
    """output: (B, V) log-probs (f32 or bf16), target: (B,) int. Scalar loss."""
    B, V = output.shape
    assert V == tgt_vocab_size
    assert 0.0 < label_smoothing <= 1.0
    # If ignore_index were negative (PyTorch default -100) the padding-column
    # zeroing would silently be a no-op; require a real column to match the
    # module's intended use (pad token id).
    assert 0 <= ignore_index < V, "ignore_index must be a valid vocab column"

    confidence = 1.0 - label_smoothing
    smoothing_value = label_smoothing / (tgt_vocab_size - 2)
    conf_log_conf = confidence * math.log(confidence) if confidence > 0 else 0.0
    smooth_log_smooth = (smoothing_value * math.log(smoothing_value)
                         if smoothing_value > 0 else 0.0)
    # Constant sum of p*log(p) for a valid (non-pad) row.
    c_row = conf_log_conf + (tgt_vocab_size - 2) * smooth_log_smooth

    itemsize = jnp.dtype(output.dtype).itemsize
    row_align = 16 if itemsize == 2 else 8   # bf16 sublane packing is (16, 128)

    # ---- per-generation VMEM budget -------------------------------------
    try:
        vmem_cap = int(pltpu.get_tpu_info().vmem_capacity_bytes)
    except Exception:
        vmem_cap = 64 * 1024 * 1024          # conservative fallback (v7x-sized)
    vmem_limit = max(32 << 20, min(int(vmem_cap * 0.6), vmem_cap - (8 << 20)))
    stream_budget = vmem_limit // 3          # bytes for the 2x double-buffered x tile

    # ---- batch tile: prefer >= 2 tiles so megacore (v7x) can shard axis 0 --
    if tile_b is None:
        B_a = _round_up(B, row_align)
        if B_a >= 2 * row_align:
            tile_b = row_align
            cap = min(B_a // 2, 256)
            for cand in range(row_align, cap + 1, row_align):
                if B_a % cand == 0:
                    tile_b = cand
        else:
            tile_b = B_a
    B_pad = _round_up(B, tile_b)
    assert tile_b % 8 == 0 or tile_b == B_pad

    # ---- vocab tile: largest lane-aligned block fitting the stream budget --
    if tile_v is None:
        max_cols = max(_LANES,
                       (stream_budget // (2 * tile_b * itemsize)) // _LANES * _LANES)
        V128 = _round_up(V, _LANES)
        if V128 <= max_cols:
            tile_v = V128
        else:
            best = _LANES
            c = _LANES
            while c <= max_cols:
                if V128 % c == 0:
                    best = c
                c += _LANES
            tile_v = best
            if tile_v < 512:
                # Poor divisor structure: pad V up to a budget-sized tile
                # instead of taking tiny (step-overhead-bound) tiles.
                tile_v = min(max_cols, 4096)
    assert tile_v % _LANES == 0
    V_pad = _round_up(V, tile_v)

    # ---- zero-pad to the tiling (padded cols/rows contribute exactly 0) ----
    x = output
    if V_pad != V or B_pad != B:
        x = jnp.pad(x, ((0, B_pad - B), (0, V_pad - V)))
    tgt = target.astype(jnp.int32)
    if B_pad != B:
        tgt = jnp.pad(tgt, (0, B_pad - B), constant_values=ignore_index)
    tgt2d = tgt.reshape(B_pad, 1)

    kernel = functools.partial(_ls_kl_partials_kernel,
                               tile_v=tile_v, padding_idx=ignore_index)

    sum_part, pick_part = pl.pallas_call(
        kernel,
        out_shape=(jax.ShapeDtypeStruct((B_pad, _LANES), jnp.float32),
                   jax.ShapeDtypeStruct((B_pad, _LANES), jnp.float32)),
        grid_spec=pltpu.PrefetchScalarGridSpec(
            num_scalar_prefetch=0,
            grid=(B_pad // tile_b, V_pad // tile_v),   # (batch tiles, vocab tiles)
            in_specs=[
                pl.BlockSpec((tile_b, tile_v), lambda i, j: (i, j)),   # log-probs
                pl.BlockSpec((tile_b, 1), lambda i, j: (i, 0)),        # targets
            ],
            # Same block for all j -> resident accumulators across the vocab axis.
            out_specs=[pl.BlockSpec((tile_b, _LANES), lambda i, j: (i, 0)),
                       pl.BlockSpec((tile_b, _LANES), lambda i, j: (i, 0))],
        ),
        compiler_params=pltpu.CompilerParams(
            dimension_semantics=("parallel", "arbitrary"),
            vmem_limit_bytes=int(vmem_limit)),
    )(x, tgt2d)

    # ---- tiny epilogue on (B,128)/(B,) arrays in the wrapper ----------------
    s_row = jnp.sum(sum_part, axis=-1)    # (B_pad,) sum_{v != pad} logp
    t_row = jnp.sum(pick_part, axis=-1)   # (B_pad,) logp[target]
    row_loss = c_row - smoothing_value * s_row - (confidence - smoothing_value) * t_row
    row_valid = tgt != ignore_index       # pad-target rows (and padded rows) -> 0
    return jnp.sum(jnp.where(row_valid, row_loss, 0.0))


def _reference_loss(logp, target, *, label_smoothing, tgt_vocab_size,
                    ignore_index):
    """Pure-JAX reference mirroring the PyTorch forward."""
    confidence = 1.0 - label_smoothing
    smoothing_value = label_smoothing / (tgt_vocab_size - 2)
    one_hot = jnp.full((tgt_vocab_size,), smoothing_value,
                       dtype=jnp.float32).at[ignore_index].set(0.0)
    mp = jnp.tile(one_hot[None, :], (target.shape[0], 1))
    mp = mp.at[jnp.arange(target.shape[0]), target].set(confidence)
    mp = jnp.where((target == ignore_index)[:, None], 0.0, mp)
    safe = jnp.where(mp > 0, mp, 1.0)
    return jnp.sum(jnp.where(mp > 0,
                             mp * (jnp.log(safe) - logp.astype(jnp.float32)),
                             0.0))


if __name__ == "__main__":
    # Module "parameters": label smoothing config (the one_hot buffer is derived
    # deterministically from these — no checkpoint needed).
    LABEL_SMOOTHING = 0.1
    TGT_VOCAB_SIZE = 2048
    IGNORE_INDEX = 0  # pad token id (must be a real column; see assert above)

    B = 16
    key = jax.random.PRNGKey(0)
    k_logits, k_tgt = jax.random.split(key)

    logits = jax.random.normal(k_logits, (B, TGT_VOCAB_SIZE), dtype=jnp.float32)
    output = jax.nn.log_softmax(logits, axis=-1)          # F.kl_div expects log-probs
    target = jax.random.randint(k_tgt, (B,), 0, TGT_VOCAB_SIZE, dtype=jnp.int32)
    target = target.at[0].set(IGNORE_INDEX)               # exercise pad-row masking

    ref = _reference_loss(
        output, target,
        label_smoothing=LABEL_SMOOTHING,
        tgt_vocab_size=TGT_VOCAB_SIZE,
        ignore_index=IGNORE_INDEX,
    )

    # 1) Default tiling: VMEM-budget blocks, >=2 batch tiles (megacore-friendly).
    loss = label_smoothing_loss(
        output, target,
        label_smoothing=LABEL_SMOOTHING,
        tgt_vocab_size=TGT_VOCAB_SIZE,
        ignore_index=IGNORE_INDEX,
    )
    loss = jax.block_until_ready(loss)
    assert jnp.allclose(loss, ref, rtol=1e-3, atol=1e-2), (loss, ref)

    # 2) Explicit small tiles: exercises both grid axes, including the resident
    #    accumulator carry across the vocab ("arbitrary") axis.
    loss2 = label_smoothing_loss(
        output, target,
        label_smoothing=LABEL_SMOOTHING,
        tgt_vocab_size=TGT_VOCAB_SIZE,
        ignore_index=IGNORE_INDEX,
        tile_b=8, tile_v=512,
    )
    loss2 = jax.block_until_ready(loss2)
    assert jnp.allclose(loss2, ref, rtol=1e-3, atol=1e-2), (loss2, ref)

    print("KERNEL_OK")
</pallas_src>

<mosaic_0001>
module attributes {stable_mosaic.version = 11 : i64} {
  func.func @_ls_kl_partials_kernel(%arg0: i32, %arg1: i32, %arg2: memref<8x2048xf32, #tpu.memory_space<vmem>>, %arg3: memref<8x1xi32, #tpu.memory_space<vmem>>, %arg4: memref<8x128xf32, #tpu.memory_space<vmem>>, %arg5: memref<8x128xf32, #tpu.memory_space<vmem>>) attributes {dimension_semantics = [#tpu.dimension_semantics<parallel>, #tpu.dimension_semantics<arbitrary>], iteration_bounds = array<i64: 2, 1>, scalar_prefetch = 0 : i64, scratch_operands = 0 : i64, tpu.core_type = #tpu.core_type<tc>, window_params = [{transform_indices = @transform_0, window_bounds = array<i64: 8, 2048>}, {transform_indices = @transform_1, window_bounds = array<i64: 8, 1>}, {transform_indices = @transform_2, window_bounds = array<i64: 8, 128>}, {transform_indices = @transform_3, window_bounds = array<i64: 8, 128>}]} {
    %c0_i32 = arith.constant 0 : i32
    %0 = arith.cmpi eq, %arg1, %c0_i32 : i32
    %1 = arith.extui %0 : i1 to i32
    %c0_i32_0 = arith.constant 0 : i32
    %2 = arith.cmpi ne, %1, %c0_i32_0 : i32
    scf.if %2 {
      %cst_48 = arith.constant 0.000000e+00 : f32
      %185 = vector.broadcast %cst_48 : f32 to vector<8x128xf32>
      %c0_49 = arith.constant 0 : index
      %c0_50 = arith.constant 0 : index
      %186 = vector.load %arg4[%c0_49, %c0_50] : memref<8x128xf32, #tpu.memory_space<vmem>>, vector<8x128xf32>
      tpu.vector_store %arg4[%c0_49, %c0_50], %185 {strides = array<i32>} : memref<8x128xf32, #tpu.memory_space<vmem>>, vector<8x128xf32>,
      %cst_51 = arith.constant 0.000000e+00 : f32
      %187 = vector.broadcast %cst_51 : f32 to vector<8x128xf32>
      %c0_52 = arith.constant 0 : index
      %c0_53 = arith.constant 0 : index
      %188 = vector.load %arg5[%c0_52, %c0_53] : memref<8x128xf32, #tpu.memory_space<vmem>>, vector<8x128xf32>
      tpu.vector_store %arg5[%c0_52, %c0_53], %187 {strides = array<i32>} : memref<8x128xf32, #tpu.memory_space<vmem>>, vector<8x128xf32>,
    } else {
    }
    %c0 = arith.constant 0 : index
    %c0_1 = arith.constant 0 : index
    %3 = vector.load %arg3[%c0, %c0_1] : memref<8x1xi32, #tpu.memory_space<vmem>>, vector<8x1xi32>
    %4 = tpu.iota {dimensions = array<i32: 1>} : vector<1x128xi32>
    %c2048_i32 = arith.constant 2048 : i32
    %5 = arith.muli %arg1, %c2048_i32 : i32
    %6 = vector.broadcast %5 : i32 to vector<8x1xi32>
    %7 = arith.subi %3, %6 : vector<8x1xi32>
    %cst = arith.constant 0.000000e+00 : f32
    %8 = vector.broadcast %cst : f32 to vector<8x128xf32>
    %cst_2 = arith.constant 0.000000e+00 : f32
    %9 = vector.broadcast %cst_2 : f32 to vector<8x128xf32>
    %c0_3 = arith.constant 0 : index
    %c0_4 = arith.constant 0 : index
    %10 = vector.load %arg2[%c0_3, %c0_4] : memref<8x2048xf32, #tpu.memory_space<vmem>>, vector<8x128xf32>
    %c0_i32_5 = arith.constant 0 : i32
    %11 = vector.broadcast %c0_i32_5 : i32 to vector<8x1xi32>
    %12 = arith.subi %7, %11 : vector<8x1xi32>
    %13 = vector.broadcast %4 : vector<1x128xi32> to vector<8x128xi32>
    %14 = vector.broadcast %12 : vector<8x1xi32> to vector<8x128xi32>
    %15 = arith.cmpi eq, %13, %14 : vector<8x128xi32>
    %cst_6 = arith.constant 0.000000e+00 : f32
    %16 = vector.broadcast %cst_6 : f32 to vector<8x128xf32>
    %17 = arith.select %15, %10, %16 : vector<8x128xi1>, vector<8x128xf32>
    %18 = arith.addf %9, %17 : vector<8x128xf32>
    %c0_i32_7 = arith.constant 0 : i32
    %19 = vector.broadcast %c0_i32_7 : i32 to vector<1x128xi32>
    %20 = arith.cmpi eq, %4, %19 : vector<1x128xi32>
    %c0_i32_8 = arith.constant 0 : i32
    %21 = arith.cmpi eq, %arg1, %c0_i32_8 : i32
    %22 = vector.broadcast %21 : i1 to vector<1x128xi1>
    %23 = arith.andi %20, %22 : vector<1x128xi1>
    %cst_9 = arith.constant 0.000000e+00 : f32
    %24 = vector.shape_cast %23 : vector<1x128xi1> to vector<1x128xi1>
    %25 = vector.broadcast %24 : vector<1x128xi1> to vector<8x128xi1>
    %26 = vector.broadcast %cst_9 : f32 to vector<8x128xf32>
    %27 = arith.select %25, %26, %10 : vector<8x128xi1>, vector<8x128xf32>
    %28 = arith.addf %8, %27 : vector<8x128xf32>
    %c0_10 = arith.constant 0 : index
    %c128 = arith.constant 128 : index
    %29 = vector.load %arg2[%c0_10, %c128] : memref<8x2048xf32, #tpu.memory_space<vmem>>, vector<8x128xf32>
    %c128_i32 = arith.constant 128 : i32
    %30 = vector.broadcast %c128_i32 : i32 to vector<8x1xi32>
    %31 = arith.subi %7, %30 : vector<8x1xi32>
    %32 = vector.broadcast %4 : vector<1x128xi32> to vector<8x128xi32>
    %33 = vector.broadcast %31 : vector<8x1xi32> to vector<8x128xi32>
    %34 = arith.cmpi eq, %32, %33 : vector<8x128xi32>
    %cst_11 = arith.constant 0.000000e+00 : f32
    %35 = vector.broadcast %cst_11 : f32 to vector<8x128xf32>
    %36 = arith.select %34, %29, %35 : vector<8x128xi1>, vector<8x128xf32>
    %37 = arith.addf %18, %36 : vector<8x128xf32>
    %38 = arith.addf %28, %29 : vector<8x128xf32>
    %c0_12 = arith.constant 0 : index
    %c256 = arith.constant 256 : index
    %39 = vector.load %arg2[%c0_12, %c256] : memref<8x2048xf32, #tpu.memory_space<vmem>>, vector<8x128xf32>
    %c256_i32 = arith.constant 256 : i32
    %40 = vector.broadcast %c256_i32 : i32 to vector<8x1xi32>
    %41 = arith.subi %7, %40 : vector<8x1xi32>
    %42 = vector.broadcast %4 : vector<1x128xi32> to vector<8x128xi32>
    %43 = vector.broadcast %41 : vector<8x1xi32> to vector<8x128xi32>
    %44 = arith.cmpi eq, %42, %43 : vector<8x128xi32>
    %cst_13 = arith.constant 0.000000e+00 : f32
    %45 = vector.broadcast %cst_13 : f32 to vector<8x128xf32>
    %46 = arith.select %44, %39, %45 : vector<8x128xi1>, vector<8x128xf32>
    %47 = arith.addf %37, %46 : vector<8x128xf32>
    %48 = arith.addf %38, %39 : vector<8x128xf32>
    %c0_14 = arith.constant 0 : index
    %c384 = arith.constant 384 : index
    %49 = vector.load %arg2[%c0_14, %c384] : memref<8x2048xf32, #tpu.memory_space<vmem>>, vector<8x128xf32>
    %c384_i32 = arith.constant 384 : i32
    %50 = vector.broadcast %c384_i32 : i32 to vector<8x1xi32>
    %51 = arith.subi %7, %50 : vector<8x1xi32>
    %52 = vector.broadcast %4 : vector<1x128xi32> to vector<8x128xi32>
    %53 = vector.broadcast %51 : vector<8x1xi32> to vector<8x128xi32>
    %54 = arith.cmpi eq, %52, %53 : vector<8x128xi32>
    %cst_15 = arith.constant 0.000000e+00 : f32
    %55 = vector.broadcast %cst_15 : f32 to vector<8x128xf32>
    %56 = arith.select %54, %49, %55 : vector<8x128xi1>, vector<8x128xf32>
    %57 = arith.addf %47, %56 : vector<8x128xf32>
    %58 = arith.addf %48, %49 : vector<8x128xf32>
    %c0_16 = arith.constant 0 : index
    %c512 = arith.constant 512 : index
    %59 = vector.load %arg2[%c0_16, %c512] : memref<8x2048xf32, #tpu.memory_space<vmem>>, vector<8x128xf32>
    %c512_i32 = arith.constant 512 : i32
    %60 = vector.broadcast %c512_i32 : i32 to vector<8x1xi32>
    %61 = arith.subi %7, %60 : vector<8x1xi32>
    %62 = vector.broadcast %4 : vector<1x128xi32> to vector<8x128xi32>
    %63 = vector.broadcast %61 : vector<8x1xi32> to vector<8x128xi32>
    %64 = arith.cmpi eq, %62, %63 : vector<8x128xi32>
    %cst_17 = arith.constant 0.000000e+00 : f32
    %65 = vector.broadcast %cst_17 : f32 to vector<8x128xf32>
    %66 = arith.select %64, %59, %65 : vector<8x128xi1>, vector<8x128xf32>
    %67 = arith.addf %57, %66 : vector<8x128xf32>
    %68 = arith.addf %58, %59 : vector<8x128xf32>
    %c0_18 = arith.constant 0 : index
    %c640 = arith.constant 640 : index
    %69 = vector.load %arg2[%c0_18, %c640] : memref<8x2048xf32, #tpu.memory_space<vmem>>, vector<8x128xf32>
    %c640_i32 = arith.constant 640 : i32
    %70 = vector.broadcast %c640_i32 : i32 to vector<8x1xi32>
    %71 = arith.subi %7, %70 : vector<8x1xi32>
    %72 = vector.broadcast %4 : vector<1x128xi32> to vector<8x128xi32>
    %73 = vector.broadcast %71 : vector<8x1xi32> to vector<8x128xi32>
    %74 = arith.cmpi eq, %72, %73 : vector<8x128xi32>
    %cst_19 = arith.constant 0.000000e+00 : f32
    %75 = vector.broadcast %cst_19 : f32 to vector<8x128xf32>
    %76 = arith.select %74, %69, %75 : vector<8x128xi1>, vector<8x128xf32>
    %77 = arith.addf %67, %76 : vector<8x128xf32>
    %78 = arith.addf %68, %69 : vector<8x128xf32>
    %c0_20 = arith.constant 0 : index
    %c768 = arith.constant 768 : index
    %79 = vector.load %arg2[%c0_20, %c768] : memref<8x2048xf32, #tpu.memory_space<vmem>>, vector<8x128xf32>
    %c768_i32 = arith.constant 768 : i32
    %80 = vector.broadcast %c768_i32 : i32 to vector<8x1xi32>
    %81 = arith.subi %7, %80 : vector<8x1xi32>
    %82 = vector.broadcast %4 : vector<1x128xi32> to vector<8x128xi32>
    %83 = vector.broadcast %81 : vector<8x1xi32> to vector<8x128xi32>
    %84 = arith.cmpi eq, %82, %83 : vector<8x128xi32>
    %cst_21 = arith.constant 0.000000e+00 : f32
    %85 = vector.broadcast %cst_21 : f32 to vector<8x128xf32>
    %86 = arith.select %84, %79, %85 : vector<8x128xi1>, vector<8x128xf32>
    %87 = arith.addf %77, %86 : vector<8x128xf32>
    %88 = arith.addf %78, %79 : vector<8x128xf32>
    %c0_22 = arith.constant 0 : index
    %c896 = arith.constant 896 : index
    %89 = vector.load %arg2[%c0_22, %c896] : memref<8x2048xf32, #tpu.memory_space<vmem>>, vector<8x128xf32>
    %c896_i32 = arith.constant 896 : i32
    %90 = vector.broadcast %c896_i32 : i32 to vector<8x1xi32>
    %91 = arith.subi %7, %90 : vector<8x1xi32>
    %92 = vector.broadcast %4 : vector<1x128xi32> to vector<8x128xi32>
    %93 = vector.broadcast %91 : vector<8x1xi32> to vector<8x128xi32>
    %94 = arith.cmpi eq, %92, %93 : vector<8x128xi32>
    %cst_23 = arith.constant 0.000000e+00 : f32
    %95 = vector.broadcast %cst_23 : f32 to vector<8x128xf32>
    %96 = arith.select %94, %89, %95 : vector<8x128xi1>, vector<8x128xf32>
    %97 = arith.addf %87, %96 : vector<8x128xf32>
    %98 = arith.addf %88, %89 : vector<8x128xf32>
    %c0_24 = arith.constant 0 : index
    %c1024 = arith.constant 1024 : index
    %99 = vector.load %arg2[%c0_24, %c1024] : memref<8x2048xf32, #tpu.memory_space<vmem>>, vector<8x128xf32>
    %c1024_i32 = arith.constant 1024 : i32
    %100 = vector.broadcast %c1024_i32 : i32 to vector<8x1xi32>
    %101 = arith.subi %7, %100 : vector<8x1xi32>
    %102 = vector.broadcast %4 : vector<1x128xi32> to vector<8x128xi32>
    %103 = vector.broadcast %101 : vector<8x1xi32> to vector<8x128xi32>
    %104 = arith.cmpi eq, %102, %103 : vector<8x128xi32>
    %cst_25 = arith.constant 0.000000e+00 : f32
    %105 = vector.broadcast %cst_25 : f32 to vector<8x128xf32>
    %106 = arith.select %104, %99, %105 : vector<8x128xi1>, vector<8x128xf32>
    %107 = arith.addf %97, %106 : vector<8x128xf32>
    %108 = arith.addf %98, %99 : vector<8x128xf32>
    %c0_26 = arith.constant 0 : index
    %c1152 = arith.constant 1152 : index
    %109 = vector.load %arg2[%c0_26, %c1152] : memref<8x2048xf32, #tpu.memory_space<vmem>>, vector<8x128xf32>
    %c1152_i32 = arith.constant 1152 : i32
    %110 = vector.broadcast %c1152_i32 : i32 to vector<8x1xi32>
    %111 = arith.subi %7, %110 : vector<8x1xi32>
    %112 = vector.broadcast %4 : vector<1x128xi32> to vector<8x128xi32>
    %113 = vector.broadcast %111 : vector<8x1xi32> to vector<8x128xi32>
    %114 = arith.cmpi eq, %112, %113 : vector<8x128xi32>
    %cst_27 = arith.constant 0.000000e+00 : f32
    %115 = vector.broadcast %cst_27 : f32 to vector<8x128xf32>
    %116 = arith.select %114, %109, %115 : vector<8x128xi1>, vector<8x128xf32>
    %117 = arith.addf %107, %116 : vector<8x128xf32>
    %118 = arith.addf %108, %109 : vector<8x128xf32>
    %c0_28 = arith.constant 0 : index
    %c1280 = arith.constant 1280 : index
    %119 = vector.load %arg2[%c0_28, %c1280] : memref<8x2048xf32, #tpu.memory_space<vmem>>, vector<8x128xf32>
    %c1280_i32 = arith.constant 1280 : i32
    %120 = vector.broadcast %c1280_i32 : i32 to vector<8x1xi32>
    %121 = arith.subi %7, %120 : vector<8x1xi32>
    %122 = vector.broadcast %4 : vector<1x128xi32> to vector<8x128xi32>
    %123 = vector.broadcast %121 : vector<8x1xi32> to vector<8x128xi32>
    %124 = arith.cmpi eq, %122, %123 : vector<8x128xi32>
    %cst_29 = arith.constant 0.000000e+00 : f32
    %125 = vector.broadcast %cst_29 : f32 to vector<8x128xf32>
    %126 = arith.select %124, %119, %125 : vector<8x128xi1>, vector<8x128xf32>
    %127 = arith.addf %117, %126 : vector<8x128xf32>
    %128 = arith.addf %118, %119 : vector<8x128xf32>
    %c0_30 = arith.constant 0 : index
    %c1408 = arith.constant 1408 : index
    %129 = vector.load %arg2[%c0_30, %c1408] : memref<8x2048xf32, #tpu.memory_space<vmem>>, vector<8x128xf32>
    %c1408_i32 = arith.constant 1408 : i32
    %130 = vector.broadcast %c1408_i32 : i32 to vector<8x1xi32>
    %131 = arith.subi %7, %130 : vector<8x1xi32>
    %132 = vector.broadcast %4 : vector<1x128xi32> to vector<8x128xi32>
    %133 = vector.broadcast %131 : vector<8x1xi32> to vector<8x128xi32>
    %134 = arith.cmpi eq, %132, %133 : vector<8x128xi32>
    %cst_31 = arith.constant 0.000000e+00 : f32
    %135 = vector.broadcast %cst_31 : f32 to vector<8x128xf32>
    %136 = arith.select %134, %129, %135 : vector<8x128xi1>, vector<8x128xf32>
    %137 = arith.addf %127, %136 : vector<8x128xf32>
    %138 = arith.addf %128, %129 : vector<8x128xf32>
    %c0_32 = arith.constant 0 : index
    %c1536 = arith.constant 1536 : index
    %139 = vector.load %arg2[%c0_32, %c1536] : memref<8x2048xf32, #tpu.memory_space<vmem>>, vector<8x128xf32>
    %c1536_i32 = arith.constant 1536 : i32
    %140 = vector.broadcast %c1536_i32 : i32 to vector<8x1xi32>
    %141 = arith.subi %7, %140 : vector<8x1xi32>
    %142 = vector.broadcast %4 : vector<1x128xi32> to vector<8x128xi32>
    %143 = vector.broadcast %141 : vector<8x1xi32> to vector<8x128xi32>
    %144 = arith.cmpi eq, %142, %143 : vector<8x128xi32>
    %cst_33 = arith.constant 0.000000e+00 : f32
    %145 = vector.broadcast %cst_33 : f32 to vector<8x128xf32>
    %146 = arith.select %144, %139, %145 : vector<8x128xi1>, vector<8x128xf32>
    %147 = arith.addf %137, %146 : vector<8x128xf32>
    %148 = arith.addf %138, %139 : vector<8x128xf32>
    %c0_34 = arith.constant 0 : index
    %c1664 = arith.constant 1664 : index
    %149 = vector.load %arg2[%c0_34, %c1664] : memref<8x2048xf32, #tpu.memory_space<vmem>>, vector<8x128xf32>
    %c1664_i32 = arith.constant 1664 : i32
    %150 = vector.broadcast %c1664_i32 : i32 to vector<8x1xi32>
    %151 = arith.subi %7, %150 : vector<8x1xi32>
    %152 = vector.broadcast %4 : vector<1x128xi32> to vector<8x128xi32>
    %153 = vector.broadcast %151 : vector<8x1xi32> to vector<8x128xi32>
    %154 = arith.cmpi eq, %152, %153 : vector<8x128xi32>
    %cst_35 = arith.constant 0.000000e+00 : f32
    %155 = vector.broadcast %cst_35 : f32 to vector<8x128xf32>
    %156 = arith.select %154, %149, %155 : vector<8x128xi1>, vector<8x128xf32>
    %157 = arith.addf %147, %156 : vector<8x128xf32>
    %158 = arith.addf %148, %149 : vector<8x128xf32>
    %c0_36 = arith.constant 0 : index
    %c1792 = arith.constant 1792 : index
    %159 = vector.load %arg2[%c0_36, %c1792] : memref<8x2048xf32, #tpu.memory_space<vmem>>, vector<8x128xf32>
    %c1792_i32 = arith.constant 1792 : i32
    %160 = vector.broadcast %c1792_i32 : i32 to vector<8x1xi32>
    %161 = arith.subi %7, %160 : vector<8x1xi32>
    %162 = vector.broadcast %4 : vector<1x128xi32> to vector<8x128xi32>
    %163 = vector.broadcast %161 : vector<8x1xi32> to vector<8x128xi32>
    %164 = arith.cmpi eq, %162, %163 : vector<8x128xi32>
    %cst_37 = arith.constant 0.000000e+00 : f32
    %165 = vector.broadcast %cst_37 : f32 to vector<8x128xf32>
    %166 = arith.select %164, %159, %165 : vector<8x128xi1>, vector<8x128xf32>
    %167 = arith.addf %157, %166 : vector<8x128xf32>
    %168 = arith.addf %158, %159 : vector<8x128xf32>
    %c0_38 = arith.constant 0 : index
    %c1920 = arith.constant 1920 : index
    %169 = vector.load %arg2[%c0_38, %c1920] : memref<8x2048xf32, #tpu.memory_space<vmem>>, vector<8x128xf32>
    %c1920_i32 = arith.constant 1920 : i32
    %170 = vector.broadcast %c1920_i32 : i32 to vector<8x1xi32>
    %171 = arith.subi %7, %170 : vector<8x1xi32>
    %172 = vector.broadcast %4 : vector<1x128xi32> to vector<8x128xi32>
    %173 = vector.broadcast %171 : vector<8x1xi32> to vector<8x128xi32>
    %174 = arith.cmpi eq, %172, %173 : vector<8x128xi32>
    %cst_39 = arith.constant 0.000000e+00 : f32
    %175 = vector.broadcast %cst_39 : f32 to vector<8x128xf32>
    %176 = arith.select %174, %169, %175 : vector<8x128xi1>, vector<8x128xf32>
    %177 = arith.addf %167, %176 : vector<8x128xf32>
    %178 = arith.addf %168, %169 : vector<8x128xf32>
    %c0_40 = arith.constant 0 : index
    %c0_41 = arith.constant 0 : index
    %179 = vector.load %arg4[%c0_40, %c0_41] : memref<8x128xf32, #tpu.memory_space<vmem>>, vector<8x128xf32>
    %180 = arith.addf %179, %178 : vector<8x128xf32>
    %c0_42 = arith.constant 0 : index
    %c0_43 = arith.constant 0 : index
    %181 = vector.load %arg4[%c0_42, %c0_43] : memref<8x128xf32, #tpu.memory_space<vmem>>, vector<8x128xf32>
    tpu.vector_store %arg4[%c0_42, %c0_43], %180 {strides = array<i32>} : memref<8x128xf32, #tpu.memory_space<vmem>>, vector<8x128xf32>,
    %c0_44 = arith.constant 0 : index
    %c0_45 = arith.constant 0 : index
    %182 = vector.load %arg5[%c0_44, %c0_45] : memref<8x128xf32, #tpu.memory_space<vmem>>, vector<8x128xf32>
    %183 = arith.addf %182, %177 : vector<8x128xf32>
    %c0_46 = arith.constant 0 : index
    %c0_47 = arith.constant 0 : index
    %184 = vector.load %arg5[%c0_46, %c0_47] : memref<8x128xf32, #tpu.memory_space<vmem>>, vector<8x128xf32>
    tpu.vector_store %arg5[%c0_46, %c0_47], %183 {strides = array<i32>} : memref<8x128xf32, #tpu.memory_space<vmem>>, vector<8x128xf32>,
    return
  }
  func.func @transform_0(%arg0: i32, %arg1: i32) -> (i32, i32) {
    %c0_i32 = arith.constant 0 : i32
    return %arg0, %arg1 : i32, i32
  }
  func.func @transform_1(%arg0: i32, %arg1: i32) -> (i32, i32) {
    %c0_i32 = arith.constant 0 : i32
    %c0_i32_0 = arith.constant 0 : i32
    return %arg0, %c0_i32 : i32, i32
  }
  func.func @transform_2(%arg0: i32, %arg1: i32) -> (i32, i32) {
    %c0_i32 = arith.constant 0 : i32
    %c0_i32_0 = arith.constant 0 : i32
    return %arg0, %c0_i32 : i32, i32
  }
  func.func @transform_3(%arg0: i32, %arg1: i32) -> (i32, i32) {
    %c0_i32 = arith.constant 0 : i32
    %c0_i32_0 = arith.constant 0 : i32
    return %arg0, %c0_i32 : i32, i32
  }
}

</mosaic_0001>

<bundles_post_ra>
// kernel: tpu_custom_call.1
= control target key start
LH: loop header
LB: loop body
LE: loop exit
PB: predicated region body
PF: predicated region fallthrough
CT: control target
= control target key end

     0   :  { %9 = vsyncpa [#allocation3], 0  ;;  %s1143_s0 = inlined_call_operand.hbm [shape: f32[16,2048], index: 0, kind: input, shape index: {}]   ;;  %s1144_s1 = inlined_call_operand.vmem [shape: s32[16,1], index: 1, kind: input, shape index: {}]   ;;  %s1145_s2 = inlined_call_operand.hbm [shape: f32[16,128], index: 2, kind: output, shape index: {0}]   ;;  %s1146_s3 = inlined_call_operand.hbm [shape: f32[16,128], index: 3, kind: output, shape index: {1}]  }
   0x1   :  { %11 = vsyncpa [#allocation3 + $0x1], 0 }
   0x2   :  { %12 = vsyncpa [#allocation4], 0 }
   0x3   :  { %14 = vsyncpa [#allocation4 + $0x1], 0 }
   0x4   :  { %15 = vsyncpa [#allocation7], 0 }
   0x5   :  { %17 = vsyncpa [#allocation7 + $0x1], 0  ;;  %s833_s12 = smov 0   ;;  %s835_s13 = smov 0  }
   0x6   :  { %s837_s14 = smov 0   ;;  %s839_s15 = smov 0  }
   0x7   :  { %s841_s16 = smov 0   ;;  %s843_s17 = smov 0  }
   0x8 LB: > { %s558_s18 = sadd.s32 4294967295, %s807_s17   ;;  %s559_s19 = sadd.s32 4294967294, %s807_s17   ;;  %s807_s17 = sphi %s843_s17, %s23_s17   ;;  %s803_s16 = sphi %s841_s16, %s1162_s16   ;;  %s799_s15 = sphi %s839_s15, %s1161_s15   ;;  %s795_s14 = sphi %s837_s14, %s1160_s14   ;;  %s791_s13 = sphi %s835_s13, %s1159_s13   ;;  %s787_s12 = sphi %s833_s12, %s1158_s12  }
   0x9   : > { %s35_s20 = sadd.s32 1, %s803_s16  ;;  %s44_s21 = sadd.s32 1, %s795_s14 }
   0xa   : > { %p37_p0 = scmp.ge.s32.totalorder %s35_s20, 2  ;;  %p51_p1 = scmp.ne.s32.totalorder %s795_s14, %s791_s13 }
   0xb   : > { %p52_p2 = scmp.eq.s32.totalorder %s807_s17, 0  ;;  %p57_p3 = scmp.ne.s32.totalorder %s791_s13, %s787_s12 }
   0xc   : > { %s1164_s20 = smov (%p37_p0, %s35_s20), 0  ;;  %p58_p5 = scmp.eq.s32.totalorder %s558_s18, 0 }
   0xd   : > { %p874_p4 = por %p52_p2, %p51_p1  ;;  %s39_s23 = ssub.s32 %s803_s16, %s1164_s20 }
   0xe   : > { %p107_p6 = scmp.eq.s32.totalorder %s558_s18, 1  ;;  %p42_p7 = scmp.eq.s32.totalorder %s39_s23, 0 }
   0xf   : > { %p880_p8 = por %p58_p5, %p57_p3  ;;  %p113_p10 = scmp.eq.s32.totalorder %s559_s19, 1 }
  0x10   : > { %p884_p9 = por %p107_p6, %p51_p1  ;;  %p609_p13 = scmp.lt.s32.totalorder %s807_s17, 2 }
  0x11   : > { %s889_s26 = scalar_select %p42_p7, %s795_s14, %s44_s21  }
  0x12   : > { %s1150_s25 = scalar_select %p884_p9, 1, 0 }
  0x13   : > { %p891_p11 = por %p113_p10, %p57_p3  ;;  %s159_s28 = sand.u32 1, %s795_s14  }
  0x14   : > { %s562_s29 = sshll.u32 %s159_s28, 7  ;;  %s591_s30 = sshll.u32 %s803_s16, 11 }
  0x15   : > { %s1151_s27 = scalar_select %p891_p11, 1, 0 }
  0x16   : > { %s902_s6 = scalar_lea.hbm %s1143_s0, %s591_s30  ;;  %s163_s7 = scalar_lea.vmem [#allocation2], %s562_s29 }
  0x17   : > { %s173_s8 = sshll.u32 %s163_s7, 4  ;;  %p908_p0 = pnand %p609_p13, %p874_p4  ;;  %s904_s8 = int_to_ptr.vmem [resolvable:$true] %s173_s8 }
  0x18   : > { %s160_s10 = scalar_lea.sflag [#allocation3], %s159_s28  ;;  %s663_s11 = scalar_lea.hbm %s902_s6, 2048 }
  0x19   : > { %p664_p3 = scmp.ne.s32.totalorder %s902_s6, %s663_s11  ;;  %p665_p5 = pneg %p908_p0 }
  0x1a   : > { %s668_s21 = scalar_lea.hbm %s1143_s0, 4096  ;;  %p669_p4 = scmp.lt.u32.totalorder %s902_s6, %s1143_s0 }
  0x1b   : > { %p666_p6 = pnand %p665_p5, %p664_p3  ;;  %p670_p10 = scmp.lt.u32.totalorder %s668_s21, %s663_s11 }
  0x1c   : > { %p672_p12 = scmp.lt.u32.totalorder %s663_s11, %s902_s6 }
  0x1d   : > { %p667_p7 = pneg %p666_p6  ;;  %p671_p13 = por %p670_p10, %p669_p4 }
  0x1f   : > { %p673_p1 = por %p672_p12, %p671_p13 }
  0x21   : > { %p674_p2 = pnand %p673_p1, %p667_p7 }
  0x23   : > { %677 = shalt.err (!%p674_p2)
}
  0x24   : > { %s678_s28 = scalar_lea.vmem %s904_s8, 2048  ;;  %s809_s29 = smov [#allocation2]  }
  0x25   : > { %p679_p3 = scmp.ne.s32.totalorder %s904_s8, %s678_s28  ;;  %s683_s30 = sshll.u32 %s809_s29, 4  ;;  %s684_s30 = int_to_ptr.vmem [resolvable:$false] %s683_s30 }
  0x26   : > { %s685_s4 = scalar_lea.vmem %s684_s30, 4096  ;;  %p686_p9 = scmp.lt.s32.totalorder %s904_s8, %s684_s30 }
  0x27   : > { %p681_p6 = pnand %p679_p3, %p665_p5  ;;  %p687_p4 = scmp.lt.s32.totalorder %s685_s4, %s678_s28 }
  0x29   : > { %p682_p11 = pneg %p681_p6  ;;  %p688_p10 = por %p687_p4, %p686_p9 }
  0x2b   : > { %p689_p12 = pnand %p688_p10, %p682_p11 }
  0x2d   : > { %692 = shalt.err (!%p689_p12)
}
  0x2e   : > { %601 = dma.hbm_to_vmem [thread:$0]  (!%p908_p0), %s902_s6, 2048, %s904_s8, %s160_s10  }
  0x2f   : > { %p1153_p1 = scmp.lt.s32.totalorder %s807_s17, 3  ;;  %p1154_p2 = scmp.ge.s32.totalorder %s807_s17, 1 }
  0x31   : > { %p186_p5 = pnand %p1154_p2, %p1153_p1 }
  0x32   : > { %s944_s5 = sand.u32 (!%p186_p5), 1, %s791_s13  }
  0x33   : > { %189 = sbr.rel (%p186_p5) target bundleno = 244 (0xf4), region = 28  ;;  %s566_s7 = sshll.u32 (!%p186_p5), %s944_s5, 7 }
  0x34   : > { %s192_s11 = scalar_lea.sflag (!%p186_p5), [#allocation3], %s944_s5  ;;  %s948_s18 = scalar_lea.vmem (!%p186_p5), [#allocation2], %s566_s7 }
  0x3a   : > { %774 = dma.done.wait (%p880_p8), %s192_s11, 2048  }
  0x3b   : > { %776 = vsyncadd (%p880_p8), %s192_s11, 4294965248  ;;  %p228_p9 = scmp.lt.s32.totalorder %s799_s15, 1  ;;  %v810_v0 = vmov 0   ;;  %v239_v1 = vlaneseq  ;;  %v963_v7 = vld [vmem:[%s948_s18] sm:$0xff]  ;;  %v967_v9 = vld [vmem:[%s948_s18 + $0x8] sm:$0xff]  ;;  %s567_s24 = sshll.u32 %s944_s5, 3 }
  0x3c   : > { %661 = vset.pattern.permute.xlu0 %v810_v0  ;;  %662 = vset.pattern.permute.xlu1 %v810_v0  ;;  %v971_v12 = vld [vmem:[%s948_s18 + $0x10] sm:$0xff]  ;;  %v975_v15 = vld [vmem:[%s948_s18 + $0x18] sm:$0xff]  ;;  %v979_v18 = vld [vmem:[%s948_s18 + $0x20] sm:$0xff]  ;;  %s219_s21 = scalar_lea.vmem [#allocation5], %s567_s24  ;;  %s587_s22 = sshll.u32 %s799_s15, 7 }
  0x3d   : > { %s229_s6 = scalar_select %p228_p9, %s799_s15, 1  ;;  %v959_v2 = vand.u32 127, %v239_v1  ;;  %v983_v21 = vld [vmem:[%s948_s18 + $0x28] sm:$0xff]  ;;  %v987_v24 = vld [vmem:[%s948_s18 + $0x30] sm:$0xff]  ;;  %v991_v27 = vld [vmem:[%s948_s18 + $0x38] sm:$0xff] }
  0x3e   : > { %v995_v30 = vld [vmem:[%s948_s18 + $0x40] sm:$0xff]  ;;  %v999_v33 = vld [vmem:[%s948_s18 + $0x48] sm:$0xff]  ;;  %v1003_v36 = vld [vmem:[%s948_s18 + $0x50] sm:$0xff]  ;;  %s420_s23 = sshll.u32 %s219_s21, 4  ;;  %s1035_s30 = scalar_lea.hbm %s1145_s2, %s587_s22  ;;  %s421_s23 = int_to_ptr.vmem [resolvable:$true] %s420_s23 }
  0x3f   : > { %s569_s8 = sshll.u32 %s229_s6, 3  ;;  %vm251_vm0 = vcmp.eq.s32.totalorder %v959_v2, 0  ;;  %v1007_v39 = vld [vmem:[%s948_s18 + $0x58] sm:$0xff]  ;;  %v1011_v42 = vld [vmem:[%s948_s18 + $0x60] sm:$0xff]  ;;  %v1015_v45 = vld [vmem:[%s948_s18 + $0x68] sm:$0xff]  ;;  %s402_s4 = scalar_lea.sflag [#allocation4], %s944_s5 }
  0x40   : > { %s231_s19 = scalar_lea.vmem %s1144_s1, %s569_s8  ;;  %v258_v8 = vsel %vm251_vm0, 0.0, %v963_v7  ;;  %v1019_v47 = vld [vmem:[%s948_s18 + $0x70] sm:$0xff]  ;;  %v1023_v49 = vld [vmem:[%s948_s18 + $0x78] sm:$0xff]  ;;  %s693_s7 = scalar_lea.vmem %s421_s23, 128 }
  0x41   : > { %v238_v3 = vld [vmem:[%s231_s19] sm:$0xff]  ;;  %v268_v11 = vadd.f32 %v967_v9, %v258_v8  ;;  %p694_p8 = scmp.ne.s32.totalorder %s421_s23, %s693_s7  ;;  %p1155_p11 = scmp.ne.s32.totalorder %s1150_s25, 0 }
  0x42   : > { %246 = vperm.xlu0 %661, %v238_v3   ;;  %v571_v4 = vadd.s32 4294967040, %v238_v3  ;;  %v570_v5 = vadd.s32 4294967168, %v238_v3  ;;  %v572_v6 = vadd.s32 4294966912, %v238_v3  ;;  %v573_v10 = vadd.s32 4294966784, %v238_v3  ;;  %s811_s11 = smov [#allocation5]  }
  0x43   : > { %v574_v13 = vadd.s32 4294966656, %v238_v3  ;;  %v277_v14 = vadd.f32 %v971_v12, %v268_v11  ;;  %v575_v16 = vadd.s32 4294966528, %v238_v3  ;;  %v576_v19 = vadd.s32 4294966400, %v238_v3  ;;  %p695_p0 = pnand %p694_p8, %p1155_p11  ;;  %s697_s18 = sshll.u32 %s811_s11, 4  ;;  %s698_s18 = int_to_ptr.vmem [resolvable:$false] %s697_s18 }
  0x44   : > { %272 = vperm.xlu1 %662, %v571_v4   ;;  %v577_v22 = vadd.s32 4294966272, %v238_v3  ;;  %v578_v25 = vadd.s32 4294966144, %v238_v3  ;;  %v579_v28 = vadd.s32 4294966016, %v238_v3  ;;  %v580_v31 = vadd.s32 4294965888, %v238_v3  ;;  %s699_s6 = scalar_lea.vmem %s698_s18, 256  ;;  %p700_p13 = scmp.lt.s32.totalorder %s421_s23, %s698_s18 }
  0x45   : > { %v286_v17 = vadd.f32 %v975_v15, %v277_v14  ;;  %v581_v34 = vadd.s32 4294965760, %v238_v3  ;;  %v582_v37 = vadd.s32 4294965632, %v238_v3  ;;  %v583_v40 = vadd.s32 4294965504, %v238_v3  ;;  %p696_p7 = pneg %p695_p0  ;;  %p701_p3 = scmp.lt.s32.totalorder %s699_s6, %s693_s7 }
  0x46   : > { %263 = vperm.xlu0 %661, %v570_v5   ;;  %v584_v43 = vadd.s32 4294965376, %v238_v3 }
  0x47   : > { %v295_v20 = vadd.f32 %v979_v18, %v286_v17  ;;  %p702_p6 = por %p701_p3, %p700_p13 }
  0x48   : > { %281 = vperm.xlu1 %662, %v572_v6  }
  0x49   : > { %v304_v23 = vadd.f32 %v983_v21, %v295_v20  ;;  %p703_p4 = pnand %p702_p6, %p696_p7 }
  0x4a   : > { %290 = vperm.xlu0 %661, %v573_v10  }
  0x4b   : > { %v313_v26 = vadd.f32 %v987_v24, %v304_v23 }
  0x4c   : > { %299 = vperm.xlu1 %662, %v574_v13  }
  0x4d   : > { %v322_v29 = vadd.f32 %v991_v27, %v313_v26 }
  0x4e   : > { %308 = vperm.xlu0 %661, %v575_v16  }
  0x4f   : > { %v331_v32 = vadd.f32 %v995_v30, %v322_v29 }
  0x50   : > { %317 = vperm.xlu1 %662, %v576_v19  }
  0x51   : > { %v340_v35 = vadd.f32 %v999_v33, %v331_v32 }
  0x52   : > { %326 = vperm.xlu0 %661, %v577_v22  }
  0x53   : > { %v349_v38 = vadd.f32 %v1003_v36, %v340_v35 }
  0x54   : > { %335 = vperm.xlu1 %662, %v578_v25  }
  0x55   : > { %v358_v41 = vadd.f32 %v1007_v39, %v349_v38 }
  0x56   : > { %344 = vperm.xlu0 %661, %v579_v28  }
  0x57   : > { %v367_v44 = vadd.f32 %v1011_v42, %v358_v41 }
  0x58   : > { %353 = vperm.xlu1 %662, %v580_v31  }
  0x59   : > { %v376_v46 = vadd.f32 %v1015_v45, %v367_v44 }
  0x5a   : > { %362 = vperm.xlu0 %661, %v581_v34  }
  0x5b   : > { %v385_v48 = vadd.f32 %v1019_v47, %v376_v46 }
  0x5c   : > { %371 = vperm.xlu1 %662, %v582_v37  }
  0x5d   : > { %v394_v50 = vadd.f32 %v1023_v49, %v385_v48 }
  0x5e   : > { %380 = vperm.xlu0 %661, %v583_v40  }
  0x5f   : > { %397 = vst [vmem:[%s219_s21] sm:$0xff] %v394_v50 }
  0x60   : > { %389 = vperm.xlu1 %662, %v584_v43  }
  0x61   : > { %706 = shalt.err (!%p703_p4)
}
  0x62   : > { %s707_s8 = scalar_lea.hbm %s1035_s30, 128  ;;  %s711_s19 = scalar_lea.hbm %s1145_s2, 256 }
  0x63   : > { %p708_p10 = scmp.ne.s32.totalorder %s1035_s30, %s707_s8  ;;  %p712_p2 = scmp.lt.u32.totalorder %s1035_s30, %s1145_s2 }
  0x64   : > { %p713_p5 = scmp.lt.u32.totalorder %s711_s19, %s707_s8  ;;  %p715_p8 = scmp.lt.u32.totalorder %s707_s8, %s1035_s30 }
  0x65   : > { %p709_p12 = pnand %p708_p10, %p1155_p11 }
  0x66   : > { %p714_p9 = por %p713_p5, %p712_p2 }
  0x67   : > { %p710_p1 = pneg %p709_p12 }
  0x68   : > { %p716_p0 = por %p715_p8, %p714_p9 }
  0x6a   : > { %p717_p7 = pnand %p716_p0, %p710_p1 }
  0x6c   : > { %720 = shalt.err (!%p717_p7)
}
  0x6d   : > { %594 = dma.vmem_to_hbm [thread:$0]  (%p1155_p11), %s421_s23, 128, %s1035_s30, %s402_s4  }
  0x6e   : > { %s226_s23 = scalar_lea.vmem [#allocation6], %s567_s24  ;;  %s1094_s7 = scalar_lea.hbm %s1146_s3, %s587_s22 }
  0x6f   : > { %s433_s29 = sshll.u32 %s226_s23, 4  ;;  %s407_s11 = scalar_lea.sflag [#allocation7], %s944_s5  ;;  %s1096_s29 = int_to_ptr.vmem [resolvable:$true] %s433_s29 }
  0x70   : > { %s721_s18 = scalar_lea.vmem %s1096_s29, 128  ;;  %s812_s24 = smov [#allocation6]  }
  0x71   : > { %p722_p13 = scmp.ne.s32.totalorder %s1096_s29, %s721_s18  ;;  %s725_s6 = sshll.u32 %s812_s24, 4  ;;  %s726_s6 = int_to_ptr.vmem [resolvable:$false] %s725_s6 }
  0x72   : > { %s727_s15 = scalar_lea.vmem %s726_s6, 256  ;;  %p728_p4 = scmp.lt.s32.totalorder %s1096_s29, %s726_s6 }
  0x73   : > { %p723_p3 = pnand %p722_p13, %p1155_p11  ;;  %p729_p10 = scmp.lt.s32.totalorder %s727_s15, %s721_s18 }
  0x75   : > { %p724_p6 = pneg %p723_p3  ;;  %p730_p12 = por %p729_p10, %p728_p4 }
  0x77   : > { %p731_p1 = pnand %p730_p12, %p724_p6 }
  0xc1   : > { %v247_v51 = vpop.permute.xlu0 %246 }
  0xc2   : > { %vm248_vm1 = vcmp.eq.s32.totalorder %v959_v2, %v247_v51 }
  0xc3   : > { %v273_v52 = vpop.permute.xlu1 %272  ;;  %v249_v54 = vsel %vm248_vm1, %v963_v7, 0.0 }
  0xc4   : > { %vm274_vm2 = vcmp.eq.s32.totalorder %v959_v2, %v273_v52 }
  0xc5   : > { %v264_v53 = vpop.permute.xlu0 %263  ;;  %v275_v58 = vsel %vm274_vm2, %v971_v12, 0.0 }
  0xc6   : > { %vm265_vm3 = vcmp.eq.s32.totalorder %v959_v2, %v264_v53 }
  0xc7   : > { %v266_v55 = vsel %vm265_vm3, %v967_v9, 0.0  ;;  %v282_v56 = vpop.permute.xlu1 %281 }
  0xc8   : > { %v267_v57 = vadd.f32 %v266_v55, %v249_v54  ;;  %vm283_vm4 = vcmp.eq.s32.totalorder %v959_v2, %v282_v56 }
  0xc9   : > { %v291_v59 = vpop.permute.xlu0 %290  ;;  %v284_v61 = vsel %vm283_vm4, %v975_v15, 0.0 }
  0xca   : > { %v276_v60 = vadd.f32 %v275_v58, %v267_v57  ;;  %vm292_vm5 = vcmp.eq.s32.totalorder %v959_v2, %v291_v59 }
  0xcb   : > { %v300_v62 = vpop.permute.xlu1 %299  ;;  %v293_v0 = vsel %vm292_vm5, %v979_v18, 0.0 }
  0xcc   : > { %v285_v63 = vadd.f32 %v284_v61, %v276_v60  ;;  %vm301_vm6 = vcmp.eq.s32.totalorder %v959_v2, %v300_v62 }
  0xcd   : > { %v309_v1 = vpop.permute.xlu0 %308  ;;  %v302_v4 = vsel %vm301_vm6, %v983_v21, 0.0 }
  0xce   : > { %v294_v3 = vadd.f32 %v293_v0, %v285_v63  ;;  %vm310_vm7 = vcmp.eq.s32.totalorder %v959_v2, %v309_v1 }
  0xcf   : > { %v318_v5 = vpop.permute.xlu1 %317  ;;  %v311_v7 = vsel %vm310_vm7, %v987_v24, 0.0 }
  0xd0   : > { %v303_v6 = vadd.f32 %v302_v4, %v294_v3  ;;  %vm319_vm8 = vcmp.eq.s32.totalorder %v959_v2, %v318_v5 }
  0xd1   : > { %v327_v8 = vpop.permute.xlu0 %326  ;;  %v320_v10 = vsel %vm319_vm8, %v991_v27, 0.0 }
  0xd2   : > { %v312_v9 = vadd.f32 %v311_v7, %v303_v6  ;;  %vm328_vm9 = vcmp.eq.s32.totalorder %v959_v2, %v327_v8 }
  0xd3   : > { %v336_v11 = vpop.permute.xlu1 %335  ;;  %v329_v13 = vsel %vm328_vm9, %v995_v30, 0.0 }
  0xd4   : > { %v321_v12 = vadd.f32 %v320_v10, %v312_v9  ;;  %vm337_vm10 = vcmp.eq.s32.totalorder %v959_v2, %v336_v11 }
  0xd5   : > { %v345_v14 = vpop.permute.xlu0 %344  ;;  %v338_v16 = vsel %vm337_vm10, %v999_v33, 0.0 }
  0xd6   : > { %v330_v15 = vadd.f32 %v329_v13, %v321_v12  ;;  %vm346_vm11 = vcmp.eq.s32.totalorder %v959_v2, %v345_v14 }
  0xd7   : > { %v354_v17 = vpop.permute.xlu1 %353  ;;  %v347_v19 = vsel %vm346_vm11, %v1003_v36, 0.0 }
  0xd8   : > { %v339_v18 = vadd.f32 %v338_v16, %v330_v15  ;;  %vm355_vm12 = vcmp.eq.s32.totalorder %v959_v2, %v354_v17 }
  0xd9   : > { %v363_v20 = vpop.permute.xlu0 %362  ;;  %v356_v22 = vsel %vm355_vm12, %v1007_v39, 0.0 }
  0xda   : > { %v348_v21 = vadd.f32 %v347_v19, %v339_v18  ;;  %vm364_vm13 = vcmp.eq.s32.totalorder %v959_v2, %v363_v20 }
  0xdb   : > { %v372_v23 = vpop.permute.xlu1 %371  ;;  %v365_v25 = vsel %vm364_vm13, %v1011_v42, 0.0 }
  0xdc   : > { %v357_v24 = vadd.f32 %v356_v22, %v348_v21  ;;  %vm373_vm14 = vcmp.eq.s32.totalorder %v959_v2, %v372_v23 }
  0xdd   : > { %v381_v26 = vpop.permute.xlu0 %380  ;;  %v374_v28 = vsel %vm373_vm14, %v1015_v45, 0.0 }
  0xde   : > { %v366_v27 = vadd.f32 %v365_v25, %v357_v24  ;;  %vm382_vm15 = vcmp.eq.s32.totalorder %v959_v2, %v381_v26 }
  0xdf   : > { %v390_v29 = vpop.permute.xlu1 %389  ;;  %v383_v31 = vsel %vm382_vm15, %v1019_v47, 0.0 }
  0xe0   : > { %v375_v30 = vadd.f32 %v374_v28, %v366_v27  ;;  %vm391_vm0 = vcmp.eq.s32.totalorder %v959_v2, %v390_v29 }
  0xe1   : > { %v392_v33 = vsel %vm391_vm0, %v1023_v49, 0.0 }
  0xe2   : > { %v384_v32 = vadd.f32 %v383_v31, %v375_v30 }
  0xe4   : > { %v393_v34 = vadd.f32 %v392_v33, %v384_v32 }
  0xe6   : > { %400 = vst [vmem:[%s226_s23] sm:$0xff] %v393_v34 }
  0xe7   : > { %734 = shalt.err (!%p731_p1)
}
  0xe8   : > { %s735_s5 = scalar_lea.hbm %s1094_s7, 128  ;;  %s739_s9 = scalar_lea.hbm %s1146_s3, 256 }
  0xe9   : > { %p736_p2 = scmp.ne.s32.totalorder %s1094_s7, %s735_s5  ;;  %p740_p8 = scmp.lt.u32.totalorder %s1094_s7, %s1146_s3 }
  0xea   : > { %p741_p0 = scmp.lt.u32.totalorder %s739_s9, %s735_s5  ;;  %p743_p13 = scmp.lt.u32.totalorder %s735_s5, %s1094_s7 }
  0xeb   : > { %p737_p5 = pnand %p736_p2, %p1155_p11 }
  0xec   : > { %p742_p7 = por %p741_p0, %p740_p8 }
  0xed   : > { %p738_p9 = pneg %p737_p5 }
  0xee   : > { %p744_p3 = por %p743_p13, %p742_p7 }
  0xf0   : > { %p745_p6 = pnand %p744_p3, %p738_p9 }
  0xf2   : > { %748 = shalt.err (!%p745_p6)
}
  0xf3   : > { %595 = dma.vmem_to_hbm [thread:$0]  (%p1155_p11), %s1096_s29, 128, %s1094_s7, %s407_s11  }
  0xf4 PF: > { %s445_s21 = sand.u32 1, %s787_s12   ;;  %p1156_p4 = scmp.ne.s32.totalorder %s1151_s27, 0 }
  0xf5   : > { %p1157_p10 = scmp.ge.s32.totalorder %s807_s17, 2  ;;  %s446_s28 = scalar_lea.sflag [#allocation4], %s445_s21 }
  0xf7   : > { %p603_p12 = pnand %p1157_p10, %p1156_p4 }
  0xf9   : > { %778 = dma.done.wait (!%p603_p12), %s446_s28, 128  }
  0xfa   : > { %780 = vsyncadd (!%p603_p12), %s446_s28, 4294967168  ;;  %s455_s23 = scalar_lea.sflag [#allocation7], %s445_s21 }
  0xfb   : > { %782 = dma.done.wait (!%p603_p12), %s455_s23, 128  }
  0xfc   : > { %784 = vsyncadd (!%p603_p12), %s455_s23, 4294967168  ;;  %s23_s17 = sadd.s32 1, %s807_s17   ;;  %s1158_s12 = smov %s791_s13 }
  0xfd   : > { %p20_p1 = scmp.ge.s32.totalorder %s23_s17, 4   ;;  %s1159_s13 = smov %s795_s14 }
  0xfe   : > { %s1160_s14 = smov %s889_s26  ;;  %s1161_s15 = smov %s803_s16 }
  0xff   : > { %s1162_s16 = smov %s1164_s20  ;;  %22 = sbr.rel (!%p20_p1) target bundleno = 8 (0x8), region = 97 }
 0x106   :  { %460 = vsyncpa [#allocation3], 1 }
 0x107   :  { %462 = vsyncpa [#allocation3 + $0x1], 1 }
 0x108   :  { %463 = vsyncpa [#allocation4], 1 }
 0x109   :  { %465 = vsyncpa [#allocation4 + $0x1], 1 }
 0x10a   :  { %466 = vsyncpa [#allocation7], 1 }
 0x10b   :  { %468 = vsyncpa [#allocation7 + $0x1], 1 }

</bundles_post_ra>
